<compile_context>
chip_gen: v7x
topology: tpu7x:2x2x1
jax: 0.10.0
libtpu: 0.0.40
codegen_flags: <defaults>
</compile_context>

<pallas_src>
import functools

import jax
import jax.numpy as jnp
from jax.experimental import pallas as pl
from jax.experimental.pallas import tpu as pltpu


_LANE = 128
_MAX_TILE = 16384            # caps pass-1 unroll depth and zero-padding waste


# ---------------------------------------------------------------------------
# Per-generation VMEM budgets (queried once from the hardware).
# ---------------------------------------------------------------------------
@functools.lru_cache(maxsize=1)
def _budgets():
    try:
        cap = int(getattr(pltpu.get_tpu_info(), "vmem_capacity_bytes", 0))
    except Exception:
        cap = 0
    if cap <= 0:
        cap = 64 << 20                       # conservative (v7x-sized) fallback
    vmem_limit = (cap * 7) // 8              # 112 MiB on 128-MiB parts, 56 MiB on v7x
    # fused slab: double-buffered in + out + scale temp ~= 5x slab (+ margin)
    fused_slab = max(1 << 20, (vmem_limit - (8 << 20)) // 5)   # ~20 MiB / ~9.6 MiB
    apply_block = vmem_limit // 14           # ~8 MiB / ~4 MiB   (in/out dbl-buffered)
    red_block = vmem_limit // 7              # ~16 MiB / ~8 MiB  (no tile-sized output)
    return vmem_limit, fused_slab, apply_block, red_block


def _round_up(a, b):
    return -(-a // b) * b


def _pick_apply_tile(C, HW, itemsize, budget):
    """Largest lane-multiple tile within `budget` bytes, bounding pad waste."""
    full = _round_up(HW, _LANE)
    t = (budget // max(C * itemsize, 1)) // _LANE * _LANE
    t = max(_LANE, min(t, _MAX_TILE, full))
    if HW % t != 0:
        # zero-padding will be needed: bound the waste to ~1/8 of the traffic
        waste_cap = max(_LANE, (full // 8) // _LANE * _LANE)
        t = min(t, waste_cap)
    return t


def _pick_red_width(n_tiles, t_apply, C, itemsize, budget):
    """Pass-1 tile = k * t_apply with k | n_tiles, under its own (bigger) budget."""
    k_budget = max(1, budget // max(C * itemsize * t_apply, 1))
    k_cap = max(1, _MAX_TILE // t_apply)
    k_max = max(1, min(n_tiles, k_budget, k_cap))
    return max(kk for kk in range(1, k_max + 1) if n_tiles % kk == 0)


# ---------------------------------------------------------------------------
# Fused single-pass kernel: one (C, HW) slab per grid step.
# ---------------------------------------------------------------------------
def _scse_fused_kernel(bs_ref, x_ref, w1_ref, b1_ref, w2_ref, b2_ref, ws_ref,
                       o_ref):
    x = x_ref[0]                                              # (C, HW), native dtype

    # channel SE: global avg pool -> 1x1 conv -> relu -> 1x1 conv -> sigmoid.
    # f32 casts live inside the consuming reductions (no standalone whole-tile
    # f32 copy of the activation slab).
    mean = jnp.mean(x.astype(jnp.float32), axis=1, keepdims=True)        # (C, 1)
    z = jnp.dot(w1_ref[...], mean,
                preferred_element_type=jnp.float32) + b1_ref[...]
    z = jnp.maximum(z, 0.0)
    s = jnp.dot(w2_ref[...], z,
                preferred_element_type=jnp.float32) + b2_ref[...]
    cse = jax.nn.sigmoid(s)                                   # (C, 1) f32

    # spatial SE: 1x1 conv over channels == f32 VPU multiply + sublane reduce.
    sp = jnp.sum(ws_ref[...] * x, axis=0, keepdims=True) + bs_ref[0]
    sse = jax.nn.sigmoid(sp)                                  # (1, HW) f32

    # dtype-native fused epilogue: x*cSE + x*sSE == x*(cSE + sSE).
    scale = cse.astype(x.dtype) + sse.astype(x.dtype)         # (C, HW)
    o_ref[0] = x * scale


def _scse_fused(xf, w1, b1, w2, b2, ws_col, bs_flat, vmem_limit):
    N, C, HW = xf.shape
    Cr = w1.shape[0]
    return pl.pallas_call(
        _scse_fused_kernel,
        out_shape=jax.ShapeDtypeStruct((N, C, HW), xf.dtype),
        grid_spec=pltpu.PrefetchScalarGridSpec(
            num_scalar_prefetch=0,
            grid=(N,),
            in_specs=[
                pl.BlockSpec(memory_space=pltpu.MemorySpace.SMEM),   # bs scalar
                pl.BlockSpec((1, C, HW), lambda n: (n, 0, 0)),       # x slab
                pl.BlockSpec((Cr, C), lambda n: (0, 0)),             # cSE w1
                pl.BlockSpec((Cr, 1), lambda n: (0, 0)),             # cSE b1
                pl.BlockSpec((C, Cr), lambda n: (0, 0)),             # cSE w2
                pl.BlockSpec((C, 1), lambda n: (0, 0)),              # cSE b2
                pl.BlockSpec((C, 1), lambda n: (0, 0)),              # sSE w
            ],
            out_specs=pl.BlockSpec((1, C, HW), lambda n: (n, 0, 0)),
        ),
        compiler_params=pltpu.CompilerParams(
            dimension_semantics=("parallel",),
            vmem_limit_bytes=vmem_limit),
    )(bs_flat, xf, w1, b1, w2, b2, ws_col)


# ---------------------------------------------------------------------------
# Two-pass path, pass 1: streaming lane-wide partial sums over the HW axis.
# The cross-lane reduce + tiny cSE MLP are finalized outside (in XLA), so the
# hot loop is VALU adds + DMA only (no MXU, no XLU, no weight residency).
# ---------------------------------------------------------------------------
def _sum_kernel(x_ref, o_ref):
    t = pl.program_id(2)

    @pl.when(t == 0)
    def _():
        o_ref[...] = jnp.zeros_like(o_ref)

    # Fold the tile's 128-lane chunks with plain VALU adds; the per-chunk
    # f32 upcast happens inside each add (no whole-tile f32 temporary).
    n_chunks = x_ref.shape[2] // _LANE
    acc = x_ref[0, :, 0:_LANE].astype(jnp.float32)
    for j in range(1, n_chunks):
        acc = acc + x_ref[0, :, j * _LANE:(j + 1) * _LANE].astype(jnp.float32)
    o_ref[...] += acc[None, None, :, :]


def _sum_pass(xf, t_red, parts, vmem_limit):
    N, C, HWp = xf.shape
    n_red = HWp // t_red
    tiles_per_part = n_red // parts
    return pl.pallas_call(
        _sum_kernel,
        out_shape=jax.ShapeDtypeStruct((parts, N, C, _LANE), jnp.float32),
        grid_spec=pltpu.PrefetchScalarGridSpec(
            num_scalar_prefetch=0,
            grid=(parts, N, tiles_per_part),
            in_specs=[
                # TODO(synk): add pipeline_mode=pl.Buffered(3) if profiling shows
                # exposed DMA between steps (VMEM headroom permits it).
                pl.BlockSpec((1, C, t_red),
                             lambda p, n, t: (n, 0, p * tiles_per_part + t)),
            ],
            out_specs=pl.BlockSpec((1, 1, C, _LANE),
                                   lambda p, n, t: (p, n, 0, 0)),
        ),
        compiler_params=pltpu.CompilerParams(
            # leading 'parts' axis splits the HW reduction across both v7x
            # TensorCores even when N == 1.
            dimension_semantics=("parallel", "parallel", "arbitrary"),
            vmem_limit_bytes=vmem_limit),
    )(xf)


# ---------------------------------------------------------------------------
# Two-pass path, pass 2: streaming apply — pure VPU/XLU/EUP per lane-dense tile.
# ---------------------------------------------------------------------------
def _apply_kernel(bs_ref, cse_ref, x_ref, ws_ref, o_ref):
    x = x_ref[0]                                              # (C, T), native dtype
    # sSE reduction over channels in f32 (implicit upcast inside the multiply).
    sp = jnp.sum(ws_ref[...] * x, axis=0, keepdims=True) + bs_ref[0]
    sse = jax.nn.sigmoid(sp)                                  # (1, T) f32
    # dtype-native fused epilogue: x*cSE + x*sSE == x*(cSE + sSE).
    scale = cse_ref[0].astype(x.dtype) + sse.astype(x.dtype)  # (C, T)
    o_ref[0] = x * scale


def _apply_pass(xf, cse, ws_col, bs_flat, t_apply, vmem_limit):
    N, C, HWp = xf.shape
    return pl.pallas_call(
        _apply_kernel,
        out_shape=jax.ShapeDtypeStruct((N, C, HWp), xf.dtype),
        grid_spec=pltpu.PrefetchScalarGridSpec(
            num_scalar_prefetch=0,
            grid=(N, HWp // t_apply),
            in_specs=[
                pl.BlockSpec(memory_space=pltpu.MemorySpace.SMEM),      # bs
                pl.BlockSpec((1, C, 1), lambda n, t: (n, 0, 0)),        # cSE scale
                pl.BlockSpec((1, C, t_apply), lambda n, t: (n, 0, t)),  # x tile
                pl.BlockSpec((C, 1), lambda n, t: (0, 0)),              # sSE w
            ],
            out_specs=pl.BlockSpec((1, C, t_apply), lambda n, t: (n, 0, t)),
        ),
        compiler_params=pltpu.CompilerParams(
            dimension_semantics=("parallel", "parallel"),
            vmem_limit_bytes=vmem_limit),
    )(bs_flat, cse, xf, ws_col)


# ---------------------------------------------------------------------------
# Wrapper.
# ---------------------------------------------------------------------------
def scse_block(x, w1, b1, w2, b2, ws, bs, *, force_two_pass=False,
               t_apply=None, t_red=None):
    """SCSEBlock forward.  x: (N, C, H, W).  Returns (N, C, H, W)."""
    N, C, H, W = x.shape
    HW = H * W
    itemsize = x.dtype.itemsize
    vmem_limit, fused_slab, apply_budget, red_budget = _budgets()

    xf = x.reshape(N, C, HW)
    w1f = w1.astype(jnp.float32)
    b1f = b1.reshape(-1, 1).astype(jnp.float32)
    w2f = w2.astype(jnp.float32)
    b2f = b2.reshape(-1, 1).astype(jnp.float32)
    ws_col = ws.reshape(C, 1).astype(jnp.float32)    # (1, C, 1, 1) conv -> (C, 1)
    bs_flat = bs.reshape(1).astype(jnp.float32)

    # Fused path needs N >= 2 so the per-image slab pipeline actually overlaps
    # DMA-in / compute / DMA-out; single-image inference uses the tiled path.
    slab_bytes = C * HW * itemsize
    use_fused = (not force_two_pass) and N >= 2 and slab_bytes <= fused_slab
    if use_fused:
        out = _scse_fused(xf, w1f, b1f, w2f, b2f, ws_col, bs_flat, vmem_limit)
        return out.reshape(N, C, H, W)

    # ---- tiled two-pass path ------------------------------------------------
    if t_apply is None:
        t_a = _pick_apply_tile(C, HW, itemsize, apply_budget)
    else:
        t_a = max(_LANE, _round_up(int(t_apply), _LANE))   # validated override
    hw_pad = _round_up(HW, t_a)
    n_tiles = hw_pad // t_a

    if t_red is None:
        k = _pick_red_width(n_tiles, t_a, C, itemsize, red_budget)
    else:
        k_hint = max(1, min(n_tiles, int(t_red) // t_a))
        k = max(kk for kk in range(1, k_hint + 1) if n_tiles % kk == 0)
    t_r = k * t_a
    n_red = n_tiles // k
    parts = 2 if n_red % 2 == 0 else 1     # split the HW reduction across 2 TCs

    # Zero padding keeps the mean exact (divisor below is the TRUE H*W); the
    # padded output columns are sliced off at the end.
    xf_pad = xf if hw_pad == HW else jnp.pad(
        xf, ((0, 0), (0, 0), (0, hw_pad - HW)))

    # pass 1: lane-wide partial sums; cross-lane reduce + the two tiny cSE
    # matmuls for the whole batch run once in XLA (keeps MXU and weight
    # residency out of the streaming reduction).
    partial = _sum_pass(xf_pad, t_r, parts, vmem_limit)         # (P, N, C, 128)
    mean = partial.sum(axis=(0, 3)) * (1.0 / HW)                # (N, C)
    z = jnp.maximum(
        jnp.dot(mean, w1f.T, precision=jax.lax.Precision.HIGHEST) + b1f[:, 0],
        0.0)                                                    # (N, C//r)
    cse = jax.nn.sigmoid(
        jnp.dot(z, w2f.T, precision=jax.lax.Precision.HIGHEST) + b2f[:, 0])
    cse = cse[:, :, None]                                       # (N, C, 1) f32

    out_pad = _apply_pass(xf_pad, cse, ws_col, bs_flat, t_a, vmem_limit)
    return out_pad[:, :, :HW].reshape(N, C, H, W)


def scse_reference(x, w1, b1, w2, b2, ws, bs):
    """Plain-JAX reference mirroring the PyTorch forward."""
    hp = jax.lax.Precision.HIGHEST
    xf = x.astype(jnp.float32)
    mean = jnp.mean(xf, axis=(2, 3))                                  # (N, C)
    z = jnp.maximum(
        jnp.einsum('rc,nc->nr', w1, mean, precision=hp) + b1.reshape(1, -1), 0.0)
    s = jax.nn.sigmoid(
        jnp.einsum('cr,nr->nc', w2, z, precision=hp) + b2.reshape(1, -1))
    cse = s[:, :, None, None]
    sp = jnp.einsum('oc,nchw->nohw', ws.reshape(1, -1), xf,
                    precision=hp) + bs.reshape(())
    sse = jax.nn.sigmoid(sp)                                          # (N,1,H,W)
    return xf * cse + xf * sse


if __name__ == "__main__":
    def make_params(key, planes, reduction):
        cr = max(1, planes // reduction)
        k1, k2, k3, k4, k5, k6 = jax.random.split(key, 6)
        w1 = 0.1 * jax.random.normal(k1, (cr, planes), dtype=jnp.float32)
        b1 = 0.1 * jax.random.normal(k2, (cr, 1), dtype=jnp.float32)
        w2 = 0.1 * jax.random.normal(k3, (planes, cr), dtype=jnp.float32)
        b2 = 0.1 * jax.random.normal(k4, (planes, 1), dtype=jnp.float32)
        ws = 0.1 * jax.random.normal(k5, (1, planes), dtype=jnp.float32)
        bs = 0.1 * jax.random.normal(k6, (1, 1), dtype=jnp.float32)
        return w1, b1, w2, b2, ws, bs

    key = jax.random.PRNGKey(0)
    kp, kx1, kx2 = jax.random.split(key, 3)

    planes, reduction = 16, 8
    params = make_params(kp, planes, reduction)

    # --- test 1: fused single-pass path (N>=2, slab fits the VMEM budget) ---
    x1 = jax.random.normal(kx1, (2, planes, 16, 16), dtype=jnp.float32)
    ref1 = scse_reference(x1, *params)
    out1 = jax.block_until_ready(scse_block(x1, *params))
    assert out1.shape == x1.shape
    assert jnp.allclose(out1, ref1, atol=1e-3, rtol=1e-3), "fused mismatch"

    # --- test 2: forced two-pass path (lane tiles, dual-TC pass-1 split) ----
    out2 = jax.block_until_ready(
        scse_block(x1, *params, force_two_pass=True, t_apply=128, t_red=128))
    assert jnp.allclose(out2, ref1, atol=1e-3, rtol=1e-3), "two-pass mismatch"

    # --- test 3: N=1 + non-128-multiple H*W (zero-padded tiles, true mean) --
    x2 = jax.random.normal(kx2, (1, planes, 15, 13), dtype=jnp.float32)
    ref2 = scse_reference(x2, *params)
    out3 = jax.block_until_ready(scse_block(x2, *params))
    assert out3.shape == x2.shape
    assert jnp.allclose(out3, ref2, atol=1e-3, rtol=1e-3), "padded mismatch"

    # --- test 4: bf16 activations exercise the dtype-native epilogue --------
    xb = x1.astype(jnp.bfloat16)
    refb = scse_reference(xb, *params)
    outb = jax.block_until_ready(scse_block(xb, *params))
    assert jnp.allclose(outb.astype(jnp.float32), refb,
                        atol=0.1, rtol=0.1), "bf16 mismatch"

    print("KERNEL_OK")
</pallas_src>

<mosaic_0001>
module attributes {stable_mosaic.version = 11 : i64} {
  func.func @_scse_fused_kernel(%arg0: i32, %arg1: memref<1xf32, #tpu.memory_space<smem>>, %arg2: memref<1x16x256xf32, #tpu.memory_space<vmem>>, %arg3: memref<2x16xf32, #tpu.memory_space<vmem>>, %arg4: memref<2x1xf32, #tpu.memory_space<vmem>>, %arg5: memref<16x2xf32, #tpu.memory_space<vmem>>, %arg6: memref<16x1xf32, #tpu.memory_space<vmem>>, %arg7: memref<16x1xf32, #tpu.memory_space<vmem>>, %arg8: memref<1x16x256xf32, #tpu.memory_space<vmem>>) attributes {dimension_semantics = [#tpu.dimension_semantics<parallel>], iteration_bounds = array<i64: 2>, scalar_prefetch = 0 : i64, scratch_operands = 0 : i64, tpu.core_type = #tpu.core_type<tc>, window_params = [{transform_indices = @transform_0, window_bounds = array<i64: 1>}, {transform_indices = @transform_1, window_bounds = array<i64: 1, 16, 256>}, {pipeline_mode = #tpu.pipeline_mode<synchronous>, transform_indices = @transform_2, window_bounds = array<i64: 2, 16>}, {pipeline_mode = #tpu.pipeline_mode<synchronous>, transform_indices = @transform_3, window_bounds = array<i64: 2, 1>}, {pipeline_mode = #tpu.pipeline_mode<synchronous>, transform_indices = @transform_4, window_bounds = array<i64: 16, 2>}, {pipeline_mode = #tpu.pipeline_mode<synchronous>, transform_indices = @transform_5, window_bounds = array<i64: 16, 1>}, {pipeline_mode = #tpu.pipeline_mode<synchronous>, transform_indices = @transform_6, window_bounds = array<i64: 16, 1>}, {transform_indices = @transform_7, window_bounds = array<i64: 1, 16, 256>}]} {
    %c0 = arith.constant 0 : index
    %c0_0 = arith.constant 0 : index
    %c0_1 = arith.constant 0 : index
    %0 = vector.load %arg2[%c0, %c0_0, %c0_1] : memref<1x16x256xf32, #tpu.memory_space<vmem>>, vector<1x16x256xf32>
    %1 = vector.shape_cast %0 : vector<1x16x256xf32> to vector<16x256xf32>
    %cst = arith.constant dense<0.000000e+00> : vector<16xf32>
    %2 = vector.multi_reduction <add>, %1, %cst [1] : vector<16x256xf32> to vector<16xf32>
    %3 = vector.shape_cast %2 : vector<16xf32> to vector<16x1xf32>
    %cst_2 = arith.constant 2.560000e+02 : f32
    %4 = vector.broadcast %cst_2 : f32 to vector<16x1xf32>
    %5 = arith.divf %3, %4 : vector<16x1xf32>
    %c0_3 = arith.constant 0 : index
    %c0_4 = arith.constant 0 : index
    %6 = vector.load %arg3[%c0_3, %c0_4] : memref<2x16xf32, #tpu.memory_space<vmem>>, vector<2x16xf32>
    %cst_5 = arith.constant dense<0.000000e+00> : vector<2x1xf32>
    %7 = tpu.matmul %6, %5, %cst_5 {dimension_numbers = #tpu.dot_dimension_numbers<[1], [0], [0], [1], [0, 0, 1, 1], [], []>} : vector<2x16xf32>, vector<16x1xf32>, vector<2x1xf32> -> vector<2x1xf32>
    %c0_6 = arith.constant 0 : index
    %c0_7 = arith.constant 0 : index
    %8 = vector.load %arg4[%c0_6, %c0_7] : memref<2x1xf32, #tpu.memory_space<vmem>>, vector<2x1xf32>
    %9 = arith.addf %7, %8 : vector<2x1xf32>
    %cst_8 = arith.constant 0.000000e+00 : f32
    %10 = vector.broadcast %cst_8 : f32 to vector<2x1xf32>
    %11 = arith.maximumf %9, %10 : vector<2x1xf32>
    %c0_9 = arith.constant 0 : index
    %c0_10 = arith.constant 0 : index
    %12 = vector.load %arg5[%c0_9, %c0_10] : memref<16x2xf32, #tpu.memory_space<vmem>>, vector<16x2xf32>
    %cst_11 = arith.constant dense<0.000000e+00> : vector<16x1xf32>
    %13 = tpu.matmul %12, %11, %cst_11 {dimension_numbers = #tpu.dot_dimension_numbers<[1], [0], [0], [1], [0, 0, 1, 1], [], []>} : vector<16x2xf32>, vector<2x1xf32>, vector<16x1xf32> -> vector<16x1xf32>
    %c0_12 = arith.constant 0 : index
    %c0_13 = arith.constant 0 : index
    %14 = vector.load %arg6[%c0_12, %c0_13] : memref<16x1xf32, #tpu.memory_space<vmem>>, vector<16x1xf32>
    %15 = arith.addf %13, %14 : vector<16x1xf32>
    %16 = arith.negf %15 : vector<16x1xf32>
    %17 = math.exp %16 : vector<16x1xf32>
    %cst_14 = arith.constant 1.000000e+00 : f32
    %18 = vector.broadcast %cst_14 : f32 to vector<16x1xf32>
    %19 = arith.addf %18, %17 : vector<16x1xf32>
    %20 = arith.divf %18, %19 : vector<16x1xf32>
    %c0_15 = arith.constant 0 : index
    %c0_16 = arith.constant 0 : index
    %21 = vector.load %arg7[%c0_15, %c0_16] : memref<16x1xf32, #tpu.memory_space<vmem>>, vector<16x1xf32>
    %22 = vector.broadcast %21 : vector<16x1xf32> to vector<16x256xf32>
    %23 = arith.mulf %22, %1 : vector<16x256xf32>
    %cst_17 = arith.constant dense<0.000000e+00> : vector<256xf32>
    %24 = vector.multi_reduction <add>, %23, %cst_17 [0] : vector<16x256xf32> to vector<256xf32>
    %25 = vector.shape_cast %24 : vector<256xf32> to vector<1x256xf32>
    %c0_18 = arith.constant 0 : index
    %26 = memref.load %arg1[%c0_18] : memref<1xf32, #tpu.memory_space<smem>>
    %27 = vector.broadcast %26 : f32 to vector<1x256xf32>
    %28 = arith.addf %25, %27 : vector<1x256xf32>
    %29 = arith.negf %28 : vector<1x256xf32>
    %30 = math.exp %29 : vector<1x256xf32>
    %cst_19 = arith.constant 1.000000e+00 : f32
    %31 = vector.broadcast %cst_19 : f32 to vector<1x256xf32>
    %32 = arith.addf %31, %30 : vector<1x256xf32>
    %33 = arith.divf %31, %32 : vector<1x256xf32>
    %34 = vector.broadcast %20 : vector<16x1xf32> to vector<16x256xf32>
    %35 = vector.broadcast %33 : vector<1x256xf32> to vector<16x256xf32>
    %36 = arith.addf %34, %35 : vector<16x256xf32>
    %37 = arith.mulf %1, %36 : vector<16x256xf32>
    %c0_20 = arith.constant 0 : index
    %c0_21 = arith.constant 0 : index
    %c0_22 = arith.constant 0 : index
    %38 = vector.load %arg8[%c0_20, %c0_21, %c0_22] : memref<1x16x256xf32, #tpu.memory_space<vmem>>, vector<1x16x256xf32>
    %39 = vector.shape_cast %38 : vector<1x16x256xf32> to vector<16x256xf32>
    %40 = vector.shape_cast %37 : vector<16x256xf32> to vector<1x16x256xf32>
    tpu.vector_store %arg8[%c0_20, %c0_21, %c0_22], %40 {strides = array<i32>} : memref<1x16x256xf32, #tpu.memory_space<vmem>>, vector<1x16x256xf32>,
    return
  }
  func.func @transform_0(%arg0: i32) -> i32 {
    %c0_i32 = arith.constant 0 : i32
    %c0_i32_0 = arith.constant 0 : i32
    return %c0_i32 : i32
  }
  func.func @transform_1(%arg0: i32) -> (i32, i32, i32) {
    %c0_i32 = arith.constant 0 : i32
    %c0_i32_0 = arith.constant 0 : i32
    %c0_i32_1 = arith.constant 0 : i32
    return %arg0, %c0_i32, %c0_i32_0 : i32, i32, i32
  }
  func.func @transform_2(%arg0: i32) -> (i32, i32) {
    %c0_i32 = arith.constant 0 : i32
    %c0_i32_0 = arith.constant 0 : i32
    %c0_i32_1 = arith.constant 0 : i32
    return %c0_i32, %c0_i32_0 : i32, i32
  }
  func.func @transform_3(%arg0: i32) -> (i32, i32) {
    %c0_i32 = arith.constant 0 : i32
    %c0_i32_0 = arith.constant 0 : i32
    %c0_i32_1 = arith.constant 0 : i32
    return %c0_i32, %c0_i32_0 : i32, i32
  }
  func.func @transform_4(%arg0: i32) -> (i32, i32) {
    %c0_i32 = arith.constant 0 : i32
    %c0_i32_0 = arith.constant 0 : i32
    %c0_i32_1 = arith.constant 0 : i32
    return %c0_i32, %c0_i32_0 : i32, i32
  }
  func.func @transform_5(%arg0: i32) -> (i32, i32) {
    %c0_i32 = arith.constant 0 : i32
    %c0_i32_0 = arith.constant 0 : i32
    %c0_i32_1 = arith.constant 0 : i32
    return %c0_i32, %c0_i32_0 : i32, i32
  }
  func.func @transform_6(%arg0: i32) -> (i32, i32) {
    %c0_i32 = arith.constant 0 : i32
    %c0_i32_0 = arith.constant 0 : i32
    %c0_i32_1 = arith.constant 0 : i32
    return %c0_i32, %c0_i32_0 : i32, i32
  }
  func.func @transform_7(%arg0: i32) -> (i32, i32, i32) {
    %c0_i32 = arith.constant 0 : i32
    %c0_i32_0 = arith.constant 0 : i32
    %c0_i32_1 = arith.constant 0 : i32
    return %arg0, %c0_i32, %c0_i32_0 : i32, i32, i32
  }
}

</mosaic_0001>

<bundles_post_ra>
// kernel: tpu_custom_call.1
= control target key start
LH: loop header
LB: loop body
LE: loop exit
PB: predicated region body
PF: predicated region fallthrough
CT: control target
= control target key end

     0   :  { %s1125_s0 = inlined_call_operand.<no memory space> [shape: f32[1], index: 0, kind: input, shape index: {}]   ;;  %s1126_s1 = inlined_call_operand.hbm [shape: f32[2,16,256], index: 1, kind: input, shape index: {}]   ;;  %s1127_s2 = inlined_call_operand.vmem [shape: f32[2,16], index: 2, kind: input, shape index: {}]   ;;  %s1128_s3 = inlined_call_operand.vmem [shape: f32[2,1], index: 3, kind: input, shape index: {}]   ;;  %s1129_s4 = inlined_call_operand.vmem [shape: f32[16,2], index: 4, kind: input, shape index: {}]   ;;  %s1130_s5 = inlined_call_operand.vmem [shape: f32[16,1], index: 5, kind: input, shape index: {}]   ;;  %s1131_s6 = inlined_call_operand.vmem [shape: f32[16,1], index: 6, kind: input, shape index: {}]   ;;  %s1132_s7 = inlined_call_operand.hbm [shape: f32[2,16,256], index: 7, kind: output, shape index: {}]  }
   0x1   :  { %12 = sst [smem:[#allocation2]] %s1125_s0 }
   0x2   :  { %13 = vsyncpa [#allocation4], 0 }
   0x3   :  { %15 = vsyncpa [#allocation4 + $0x1], 0 }
   0x4   :  { %16 = vsyncpa [#allocation5], 0 }
   0x5   :  { %18 = vsyncpa [#allocation5 + $0x1], 0  ;;  %s913_s26 = smov 0   ;;  %s915_s27 = smov 0  }
   0x6   :  { %s917_s28 = smov 0   ;;  %s919_s29 = smov 0  }
   0x7 LB: > { %s934_s0 = sadd.s32 4294967295, %s858_s29   ;;  %s645_s30 = sadd.s32 4294967294, %s858_s29   ;;  %s858_s29 = sphi %s919_s29, %s1145_s29   ;;  %s854_s28 = sphi %s917_s28, %s1144_s28   ;;  %s850_s27 = sphi %s915_s27, %s1143_s27   ;;  %s846_s26 = sphi %s913_s26, %s1142_s26  }
   0x8   : > { %s938_s8 = sadd.s32 1, %s858_s29   ;;  %s52_s9 = sadd.s32 1, %s854_s28 }
   0x9   : > { %s49_s10 = ssub.s32 %s858_s29, %s938_s8  ;;  %p59_p0 = scmp.ne.s32.totalorder %s854_s28, %s850_s27 }
   0xa   : > { %p50_p1 = scmp.eq.s32.totalorder %s49_s10, 0  ;;  %p60_p2 = scmp.eq.s32.totalorder %s858_s29, 0 }
   0xb   : > { %p65_p3 = scmp.ne.s32.totalorder %s850_s27, %s846_s26  ;;  %p66_p4 = scmp.eq.s32.totalorder %s934_s0, 0 }
   0xc   : > { %s950_s11 = scalar_select %p50_p1, %s854_s28, %s52_s9  }
   0xd   : > { %p952_p5 = por %p60_p2, %p59_p0  ;;  %p956_p6 = por %p66_p4, %p65_p3 }
   0xe   : > { %p194_p7 = scmp.eq.s32.totalorder %s934_s0, 1  ;;  %p200_p8 = scmp.eq.s32.totalorder %s645_s30, 1 }
   0xf   : > { %p702_p10 = scmp.lt.s32.totalorder %s858_s29, 2  ;;  %s238_s16 = sand.u32 1, %s854_s28  }
  0x10   : > { %p963_p11 = por %p194_p7, %p59_p0  ;;  %p967_p12 = por %p200_p8, %p65_p3 }
  0x11   : > { %s667_s17 = sshll.u32 %s858_s29, 9  ;;  %s648_s18 = sshll.u32 %s238_s16, 5 }
  0x12   : > { %s1136_s14 = scalar_select %p963_p11, 1, 0 }
  0x13   : > { %s1137_s15 = scalar_select %p967_p12, 1, 0 }
  0x14   : > { %s976_s21 = scalar_lea.hbm %s1126_s1, %s667_s17  ;;  %s242_s22 = scalar_lea.vmem [#allocation3], %s648_s18 }
  0x15   : > { %s249_s23 = sshll.u32 %s242_s22, 4  ;;  %p980_p13 = pnand %p702_p10, %p952_p5  ;;  %s984_s23 = int_to_ptr.vmem [resolvable:$true] %s249_s23 }
  0x16   : > { %s986_s25 = scalar_lea.sflag [#allocation4], %s238_s16  ;;  %s762_s30 = scalar_lea.hbm %s976_s21, 512 }
  0x17   : > { %p763_p0 = scmp.ne.s32.totalorder %s976_s21, %s762_s30  ;;  %p764_p1 = pneg %p980_p13 }
  0x18   : > { %s767_s12 = scalar_lea.hbm %s1126_s1, 1024  ;;  %p768_p4 = scmp.lt.u32.totalorder %s976_s21, %s1126_s1 }
  0x19   : > { %p765_p2 = pnand %p764_p1, %p763_p0  ;;  %p769_p5 = scmp.lt.u32.totalorder %s767_s12, %s762_s30 }
  0x1a   : > { %p771_p8 = scmp.lt.u32.totalorder %s762_s30, %s976_s21 }
  0x1b   : > { %p766_p3 = pneg %p765_p2  ;;  %p770_p7 = por %p769_p5, %p768_p4 }
  0x1d   : > { %p772_p10 = por %p771_p8, %p770_p7 }
  0x1f   : > { %p773_p9 = pnand %p772_p10, %p766_p3 }
  0x21   : > { %776 = shalt.err (!%p773_p9)
}
  0x22   : > { %s777_s16 = scalar_lea.vmem %s984_s23, 512  ;;  %s860_s19 = smov [#allocation3]  }
  0x23   : > { %p778_p0 = scmp.ne.s32.totalorder %s984_s23, %s777_s16  ;;  %s782_s20 = sshll.u32 %s860_s19, 4  ;;  %s783_s20 = int_to_ptr.vmem [resolvable:$false] %s782_s20 }
  0x24   : > { %s784_s22 = scalar_lea.vmem %s783_s20, 1024  ;;  %p785_p11 = scmp.lt.s32.totalorder %s984_s23, %s783_s20 }
  0x25   : > { %p780_p2 = pnand %p778_p0, %p764_p1  ;;  %p786_p4 = scmp.lt.s32.totalorder %s784_s22, %s777_s16 }
  0x27   : > { %p781_p12 = pneg %p780_p2  ;;  %p787_p5 = por %p786_p4, %p785_p11 }
  0x29   : > { %p788_p7 = pnand %p787_p5, %p781_p12 }
  0x2b   : > { %791 = shalt.err (!%p788_p7)
}
  0x2c   : > { %s861_s30 = smov 256   ;;  %s862_s9 = smov 16  }
  0x2d   : > { %697 = dma.hbm_to_vmem [thread:$0]  (!%p980_p13), %s976_s21, 512, %s984_s23, %s986_s25, %s861_s30, %s861_s30, %s862_s9  }
  0x2e   : > { %p651_p9 = scmp.ge.s32.totalorder %s858_s29, 1  ;;  %p257_p1 = scmp.lt.s32.totalorder %s858_s29, 3 }
  0x30   : > { %p258_p3 = pnand %p651_p9, %p257_p1 }
  0x31   : > { %s1017_s10 = sand.u32 (!%p258_p3), 1, %s850_s27  }
  0x32   : > { %261 = sbr.rel (%p258_p3) target bundleno = 820 (0x334), region = 48  ;;  %s652_s12 = sshll.u32 (!%p258_p3), %s1017_s10, 5 }
  0x33   : > { %s264_s17 = scalar_lea.sflag (!%p258_p3), [#allocation4], %s1017_s10  ;;  %s267_s18 = scalar_lea.vmem (!%p258_p3), [#allocation3], %s652_s12 }
  0x39   : > { %837 = dma.done.wait (%p956_p6), %s264_s17, 512  }
  0x3a   : > { %839 = vsyncadd (%p956_p6), %s264_s17, 4294966784  ;;  %v1027_v0 = vld [vmem:[%s267_s18] sm:$0xff]  ;;  %v1029_v1 = vld [vmem:[%s267_s18 + $0x8] sm:$0xff]  ;;  %v863_v6 = vmov 0.0|0.0   ;;  %vm864_vm0 = vmmov 0   ;;  %v865_v7 = vmov 0.0  }
  0x3b   : > { %v1031_v2 = vld [vmem:[%s267_s18 + $0x10] sm:$0xff]  ;;  %v302_v3 = vadd.f32 %v1029_v1, %v1027_v0  ;;  %v1035_v4 = vld [vmem:[%s267_s18 + $0x18] sm:$0xff]  ;;  %687 = vmatprep.subr.bf16.mxu0 %v863_v6  ;;  %679 = vmatprep.mubr.msk.f32.mxu0 %vm864_vm0, %v865_v7  ;;  %v311_v13 = vld [vmem:[%s1127_s2] sm:$0x3]  ;;  %vm313_vm1 = vcmask 130048   ;;  %vm392_vm2 = vcmask 15360  }
  0x3c   : > { %v305_v5 = vadd.f32 %v1035_v4, %v1031_v2  ;;  %v388_v14 = vld [vmem:[%s1129_s4] sm:$0xff]  ;;  %v866_v16 = vmov 0   ;;  %v491_v17 = vld [vmem:[%s1131_s6 + $0x8] sm:$0xff]  ;;  %vm399_vm3 = vcmask 1041408   ;;  %s520_s24 = sld [smem:[#allocation2]]  ;;  %s297_s25 = scalar_lea.vmem [#allocation6], %s652_s12 }
  0x3d   : > { %303 = vadd.xlane.f32.xlu0 %v302_v3  ;;  %684 = vmatprep.mubr.msk.f32.mxu1 %vm392_vm2, %v388_v14  ;;  %v490_v15 = vld [vmem:[%s1131_s6] sm:$0xff]  ;;  %v389_v23 = vld [vmem:[%s1129_s4 + $0x8] sm:$0xff]  ;;  %s572_s16 = sshll.u32 %s297_s25, 4  ;;  %s668_s19 = sshll.u32 %s934_s0, 9  ;;  %s1072_s16 = int_to_ptr.vmem [resolvable:$true] %s572_s16 }
  0x3e   : > { %744 = vset.pattern.permute.xlu1 %v866_v16  ;;  %745 = vset.pattern.permute.xlu0 %v866_v16  ;;  %v312_v18 = vld [vmem:[%s1128_s3] sm:$0x3]  ;;  %v391_v24 = vld [vmem:[%s1130_s5 + $0x8] sm:$0xff]  ;;  %s1079_s22 = scalar_lea.hbm %s1132_s7, %s668_s19  ;;  %s559_s0 = scalar_lea.sflag [#allocation5], %s1017_s10 }
  0x3f   : > { %494 = vperm.xlu1 %744, %v490_v15   ;;  %v390_v25 = vld [vmem:[%s1130_s5] sm:$0xff]  ;;  %s792_s30 = scalar_lea.vmem %s1072_s16, 512  ;;  %p1139_p11 = scmp.ne.s32.totalorder %s1136_s14, 0 }
  0x40   : > { %p793_p6 = scmp.ne.s32.totalorder %s1072_s16, %s792_s30  ;;  %s867_s9 = smov [#allocation6]  }
  0x41   : > { %306 = vadd.xlane.f32.xlu0 %v305_v5  ;;  %s796_s17 = sshll.u32 %s867_s9, 4  ;;  %s797_s17 = int_to_ptr.vmem [resolvable:$false] %s796_s17 }
  0x42   : > { %v521_v57 = vstv %s520_s24  ;;  %p794_p12 = pnand %p793_p6, %p1139_p11  ;;  %s798_s18 = scalar_lea.vmem %s797_s17, 1024 }
  0x43   : > { %499 = vperm.xlu1 %744, %v491_v17   ;;  %p799_p8 = scmp.lt.s32.totalorder %s1072_s16, %s797_s17  ;;  %p800_p10 = scmp.lt.s32.totalorder %s798_s18, %s792_s30 }
  0x44   : > { %p795_p13 = pneg %p794_p12 }
  0x45   : > { %p801_p0 = por %p800_p10, %p799_p8 }
  0x47   : > { %p802_p2 = pnand %p801_p0, %p795_p13 }
  0xbe   : > { %v495_v38 = vpop.permute.xlu1 %494 }
  0xbf   : > { %v502_v40 = vmul.f32 %v495_v38, %v1027_v0  ;;  %v503_v42 = vmul.f32 %v495_v38, %v1029_v1 }
  0xc2   : > { %v500_v39 = vpop.permute.xlu1 %499 }
  0xc3   : > { %v504_v41 = vmul.f32 %v500_v39, %v1031_v2  ;;  %v505_v43 = vmul.f32 %v500_v39, %v1035_v4 }
  0xc5   : > { %v506_v44 = vadd.f32 %v504_v41, %v502_v40  ;;  %v513_v45 = vadd.f32 %v505_v43, %v503_v42 }
  0xc7   : > { %v507_v46 = vrot.slane %v506_v44, 4  ;;  %v514_v47 = vrot.slane %v513_v45, 4 }
  0xc9   : > { %v508_v48 = vadd.f32 %v507_v46, %v506_v44  ;;  %v515_v49 = vadd.f32 %v514_v47, %v513_v45 }
  0xca   : > { %v304_v8 = vpop.xlane.xlu0 %303 }
  0xcb   : > { %v309_v10 = vmul.f32 0.00390625, %v304_v8  ;;  %v509_v50 = vrot.slane %v508_v48, 2  ;;  %v516_v51 = vrot.slane %v515_v49, 2 }
  0xcd   : > { %v510_v52 = vadd.f32 %v509_v50, %v508_v48  ;;  %v517_v53 = vadd.f32 %v516_v51, %v515_v49 }
  0xce   : > { %v307_v9 = vpop.xlane.xlu0 %306 }
  0xcf   : > { %v310_v11 = vmul.f32 0.00390625, %v307_v9  ;;  %v511_v54 = vrot.slane %v510_v52, 1  ;;  %v518_v55 = vrot.slane %v517_v53, 1 }
  0xd1   : > { %v688_v12 = vpack.c.bf16 %v310_v11, %v309_v10  ;;  %v512_v56 = vadd.f32 %v511_v54, %v510_v52  ;;  %v519_v58 = vadd.f32 %v518_v55, %v517_v53 }
  0xd3   : > { %689 = vmatpush3.bf16.msra.mxu0 %v688_v12  ;;  %v522_v59 = vadd.f32 %v521_v57, %v512_v56  ;;  %v523_v60 = vadd.f32 %v521_v57, %v519_v58 }
  0xd5   : > { %v660_v61 = vmul.f32 -1.442695, %v522_v59  ;;  %v661_v62 = vmul.f32 -1.442695, %v523_v60 }
  0xd6   : > { %680 = vmatmul.mubr.msk.f32.vlgmr.msra.gmra.mrb[0].mxu0 %vm313_vm1, %v311_v13 }
 0x1a9   : > { %v383_v19 = vpop.f32.mrb[0].mxu0 }
 0x1aa   : > { %v384_v20 = vadd.f32 %v383_v19, %v312_v18  ;;  %v681_v21 = vpop.f32.mrb[1].mxu0 }
 0x1ac   : > { %v387_v22 = vmax.f32 %v384_v20, 0.0 }
 0x1ae   : > { %682 = vmatprep.subr.msk.mxu1 %vm399_vm3, %v387_v22 }
 0x1af   : > { %683 = vmatpush3.msk.msra.mxu1 %vm399_vm3, %v387_v22 }
 0x1b0   : > { %685 = vmatmul.mubr.msk.f32.vlgmr.msra.gmra.mrb[0].mxu1 %vm392_vm2, %v389_v23 }
 0x283   : > { %v686_v26 = vpop.f32.mrb[0].mxu1 }
 0x284   : > { %v475_v27 = vadd.f32 %v686_v26, %v391_v24  ;;  %v469_v28 = vpop.f32.mrb[1].mxu1 }
 0x285   : > { %v470_v29 = vadd.f32 %v469_v28, %v390_v25 }
 0x286   : > { %v659_v30 = vmul.f32 -1.442695, %v475_v27 }
 0x287   : > { %v658_v31 = vmul.f32 -1.442695, %v470_v29 }
 0x288   : > { %746 = vpow2.f32 %v659_v30 }
 0x289   : > { %748 = vpow2.f32 %v658_v31 }
 0x292   : > { %v747_v32 = vpop.eup %746 }
 0x293   : > { %v749_v33 = vpop.eup %748  ;;  %v485_v34 = vadd.f32 1.0, %v747_v32 }
 0x294   : > { %v484_v35 = vadd.f32 1.0, %v749_v33 }
 0x295   : > { %750 = vrcp.f32 %v485_v34 }
 0x296   : > { %752 = vrcp.f32 %v484_v35 }
 0x297   : > { %754 = vpow2.f32 %v660_v61 }
 0x298   : > { %756 = vpow2.f32 %v661_v62 }
 0x29f   : > { %v751_v36 = vpop.eup %750 }
 0x2a0   : > { %v753_v37 = vpop.eup %752  ;;  %543 = vperm.xlu1 %744, %v751_v36  }
 0x2a1   : > { %538 = vperm.xlu0 %745, %v753_v37   ;;  %v755_v63 = vpop.eup %754 }
 0x2a2   : > { %v757_v3 = vpop.eup %756  ;;  %v530_v5 = vadd.f32 1.0, %v755_v63 }
 0x2a3   : > { %v531_v6 = vadd.f32 1.0, %v757_v3 }
 0x2a4   : > { %758 = vrcp.f32 %v530_v5 }
 0x2a5   : > { %760 = vrcp.f32 %v531_v6 }
 0x2ae   : > { %v759_v7 = vpop.eup %758 }
 0x2af   : > { %v761_v8 = vpop.eup %760 }
 0x31f   : > { %v544_v9 = vpop.permute.xlu1 %543 }
 0x320   : > { %v548_v10 = vadd.f32 %v759_v7, %v544_v9  ;;  %v549_v11 = vadd.f32 %v761_v8, %v544_v9  ;;  %v539_v12 = vpop.permute.xlu0 %538 }
 0x321   : > { %v546_v13 = vadd.f32 %v759_v7, %v539_v12  ;;  %v547_v14 = vadd.f32 %v761_v8, %v539_v12 }
 0x322   : > { %v552_v15 = vmul.f32 %v548_v10, %v1031_v2  ;;  %v553_v16 = vmul.f32 %v549_v11, %v1035_v4 }
 0x323   : > { %v550_v17 = vmul.f32 %v546_v13, %v1027_v0  ;;  %v551_v18 = vmul.f32 %v547_v14, %v1029_v1 }
 0x324   : > { %556 = vst [vmem:[%s297_s25 + $0x10] sm:$0xff] %v552_v15  ;;  %557 = vst [vmem:[%s297_s25 + $0x18] sm:$0xff] %v553_v16 }
 0x325   : > { %554 = vst [vmem:[%s297_s25] sm:$0xff] %v550_v17  ;;  %555 = vst [vmem:[%s297_s25 + $0x8] sm:$0xff] %v551_v18 }
 0x326   : > { %805 = shalt.err (!%p802_p2)
}
 0x327   : > { %s806_s13 = scalar_lea.hbm %s1079_s22, 512  ;;  %s810_s24 = scalar_lea.hbm %s1132_s7, 1024 }
 0x328   : > { %p807_p4 = scmp.ne.s32.totalorder %s1079_s22, %s806_s13  ;;  %p811_p9 = scmp.lt.u32.totalorder %s1079_s22, %s1132_s7 }
 0x329   : > { %p812_p1 = scmp.lt.u32.totalorder %s810_s24, %s806_s13  ;;  %p814_p6 = scmp.lt.u32.totalorder %s806_s13, %s1079_s22 }
 0x32a   : > { %p808_p5 = pnand %p807_p4, %p1139_p11 }
 0x32b   : > { %p813_p3 = por %p812_p1, %p811_p9 }
 0x32c   : > { %p809_p7 = pneg %p808_p5 }
 0x32d   : > { %p815_p12 = por %p814_p6, %p813_p3 }
 0x32f   : > { %p816_p13 = pnand %p815_p12, %p809_p7 }
 0x331   : > { %819 = shalt.err (!%p816_p13)
}
 0x332   : > { %s868_s12 = smov 256   ;;  %s869_s20 = smov 16  }
 0x333   : > { %692 = dma.vmem_to_hbm [thread:$0]  (%p1139_p11), %s1072_s16, 512, %s1079_s22, %s559_s0, %s868_s12, %s868_s12, %s869_s20  }
 0x334 PF: > { %s587_s30 = sand.u32 1, %s846_s26   ;;  %p1140_p8 = scmp.ne.s32.totalorder %s1137_s15, 0 }
 0x335   : > { %p1141_p10 = scmp.ge.s32.totalorder %s858_s29, 2  ;;  %s588_s9 = scalar_lea.sflag [#allocation5], %s587_s30 }
 0x337   : > { %p699_p0 = pnand %p1141_p10, %p1140_p8 }
 0x339   : > { %841 = dma.done.wait (!%p699_p0), %s588_s9, 512  }
 0x33a   : > { %843 = vsyncadd (!%p699_p0), %s588_s9, 4294966784  ;;  %p21_p2 = scmp.ge.s32.totalorder %s938_s8, 4   ;;  %s1142_s26 = smov %s850_s27 }
 0x33b   : > { %s1143_s27 = smov %s854_s28  ;;  %s1144_s28 = smov %s950_s11 }
 0x33c   : > { %s1145_s29 = smov %s938_s8  ;;  %23 = sbr.rel (!%p21_p2) target bundleno = 7 (0x7), region = 93 }
 0x343   :  { %593 = vsyncpa [#allocation4], 1 }
 0x344   :  { %595 = vsyncpa [#allocation4 + $0x1], 1 }
 0x345   :  { %596 = vsyncpa [#allocation5], 1 }
 0x346   :  { %598 = vsyncpa [#allocation5 + $0x1], 1 }

</bundles_post_ra>
